<compile_context>
chip_gen: v5e
topology: v5e:2x2
jax: 0.10.0
libtpu: 0.0.40
codegen_flags: <defaults>
</compile_context>

<pallas_src>
import functools

import jax
import jax.numpy as jnp
from jax.experimental import pallas as pl
from jax.experimental.pallas import tpu as pltpu

OBS = 8       # observation dim (flat vector obs, e.g. LunarLander)
HID = 64      # Actor MLP hidden width (CleanRL default)
ACT = 4       # number of discrete actions
NLANE = 128   # lane-dense padded logit width
TILE = 128    # rows (observations) per grid step


def actor_sample_kernel(x_ref, g_ref,
                        w1_ref, b1_ref, w2_ref, b2_ref, w3_ref, b3_ref,
                        out_ref):
    x = x_ref[...]                                                     # (TILE, OBS)
    h1 = jnp.tanh(jnp.dot(x, w1_ref[...],
                          preferred_element_type=jnp.float32) + b1_ref[...])
    h2 = jnp.tanh(jnp.dot(h1, w2_ref[...],
                          preferred_element_type=jnp.float32) + b2_ref[...])
    # w3/b3 are lane-padded to NLANE; padded lanes carry a -1e30 bias.
    logits = jnp.dot(h2, w3_ref[...],
                     preferred_element_type=jnp.float32) + b3_ref[...]  # (TILE, NLANE)

    # Categorical(logits).sample() == argmax(logits + Gumbel noise)
    z = logits + g_ref[...]
    zmax = jnp.max(z, axis=-1, keepdims=True)
    lane = jax.lax.broadcasted_iota(jnp.int32, z.shape, 1)
    action = jnp.min(jnp.where(z >= zmax, lane, NLANE),
                     axis=-1, keepdims=True)                            # (TILE, 1) int32

    # Pack: logits in lanes [0, ACT), action (exact small int as f32) in lane 127.
    out_ref[...] = jnp.where(lane == NLANE - 1, action.astype(jnp.float32), logits)


@functools.partial(jax.jit, static_argnames=("tile",))
def onnxable_agent_forward(obs, params, key, tile=TILE):
    """Returns (action[int32, (B,)], logits[f32, (B, ACT)])."""
    w1, b1, w2, b2, w3, b3 = params
    b = obs.shape[0]
    n_pad = ((b + tile - 1) // tile) * tile

    obs_p = jnp.pad(obs.astype(jnp.float32), ((0, n_pad - b), (0, 0)))
    # Lane-pad the final layer; padded logit lanes get a huge negative bias.
    w3p = jnp.zeros((HID, NLANE), jnp.float32).at[:, :ACT].set(w3)
    b3p = jnp.full((1, NLANE), -1e30, jnp.float32).at[:, :ACT].set(b3)
    gumbel = jax.random.gumbel(key, (n_pad, NLANE), jnp.float32)

    grid = (n_pad // tile,)
    batched = lambda i: (i, 0)   # noqa: E731
    pinned = lambda i: (0, 0)    # noqa: E731  (weights stay VMEM-resident)

    packed = pl.pallas_call(
        actor_sample_kernel,
        out_shape=jax.ShapeDtypeStruct((n_pad, NLANE), jnp.float32),
        grid=grid,
        in_specs=[
            pl.BlockSpec((tile, OBS), batched),     # obs
            pl.BlockSpec((tile, NLANE), batched),   # gumbel noise
            pl.BlockSpec((OBS, HID), pinned),       # w1
            pl.BlockSpec((1, HID), pinned),         # b1
            pl.BlockSpec((HID, HID), pinned),       # w2
            pl.BlockSpec((1, HID), pinned),         # b2
            pl.BlockSpec((HID, NLANE), pinned),     # w3 (lane-padded)
            pl.BlockSpec((1, NLANE), pinned),       # b3 (lane-padded)
        ],
        out_specs=pl.BlockSpec((tile, NLANE), batched),
        compiler_params=pltpu.CompilerParams(
            dimension_semantics=("parallel",)),     # v7x: shard batch over both TCs
    )(obs_p, gumbel, w1, b1, w2, b2, w3p, b3p)

    logits = packed[:b, :ACT]
    action = packed[:b, NLANE - 1].astype(jnp.int32)
    return action, logits


def init_params(key):
    k1, k2, k3 = jax.random.split(key, 3)
    w1 = jax.random.normal(k1, (OBS, HID), jnp.float32) * (1.0 / jnp.sqrt(OBS))
    b1 = jnp.zeros((1, HID), jnp.float32)
    w2 = jax.random.normal(k2, (HID, HID), jnp.float32) * (1.0 / jnp.sqrt(HID))
    b2 = jnp.zeros((1, HID), jnp.float32)
    w3 = jax.random.normal(k3, (HID, ACT), jnp.float32) * (1.0 / jnp.sqrt(HID))
    b3 = jnp.zeros((1, ACT), jnp.float32)
    return (w1, b1, w2, b2, w3, b3)


def ref_logits_fn(obs, params):
    w1, b1, w2, b2, w3, b3 = params
    h1 = jnp.tanh(obs @ w1 + b1)
    h2 = jnp.tanh(h1 @ w2 + b2)
    return h2 @ w3 + b3


if __name__ == "__main__":
    root = jax.random.PRNGKey(0)
    k_obs, k_params, k_sample, k_obs2, k_sample2 = jax.random.split(root, 5)
    params = init_params(k_params)

    # --- case 1: num_envs-sized batch (B=4), one grid step ---------------------
    B = 4
    obs = jax.random.normal(k_obs, (B, OBS), jnp.float32)
    action, logits = onnxable_agent_forward(obs, params, k_sample)
    action = jax.block_until_ready(action)
    logits = jax.block_until_ready(logits)

    ref = ref_logits_fn(obs, params)
    assert jnp.allclose(logits, ref, atol=2e-2, rtol=2e-2), "logits mismatch (B=4)"
    assert action.shape == (B,) and action.dtype == jnp.int32
    assert bool(jnp.all((action >= 0) & (action < ACT)))

    # --- case 2: batched rollout (N=300 -> 3 grid steps, weights resident) -----
    N = 300
    obs_big = jax.random.normal(k_obs2, (N, OBS), jnp.float32)
    action_b, logits_b = onnxable_agent_forward(obs_big, params, k_sample2)
    action_b = jax.block_until_ready(action_b)
    logits_b = jax.block_until_ready(logits_b)

    ref_b = ref_logits_fn(obs_big, params)
    assert jnp.allclose(logits_b, ref_b, atol=2e-2, rtol=2e-2), "logits mismatch (N=300)"
    assert action_b.shape == (N,) and action_b.dtype == jnp.int32
    assert bool(jnp.all((action_b >= 0) & (action_b < ACT)))

    print("KERNEL_OK")
</pallas_src>

<mosaic_0001>
module attributes {stable_mosaic.version = 11 : i64} {
  func.func @actor_sample_kernel(%arg0: i32, %arg1: memref<128x8xf32, #tpu.memory_space<vmem>>, %arg2: memref<128x128xf32, #tpu.memory_space<vmem>>, %arg3: memref<8x64xf32, #tpu.memory_space<vmem>>, %arg4: memref<1x64xf32, #tpu.memory_space<vmem>>, %arg5: memref<64x64xf32, #tpu.memory_space<vmem>>, %arg6: memref<1x64xf32, #tpu.memory_space<vmem>>, %arg7: memref<64x128xf32, #tpu.memory_space<vmem>>, %arg8: memref<1x128xf32, #tpu.memory_space<vmem>>, %arg9: memref<128x128xf32, #tpu.memory_space<vmem>>) attributes {dimension_semantics = [#tpu.dimension_semantics<parallel>], iteration_bounds = array<i64: 1>, scalar_prefetch = 0 : i64, scratch_operands = 0 : i64, tpu.core_type = #tpu.core_type<tc>, window_params = [{transform_indices = @transform_0, window_bounds = array<i64: 128, 8>}, {transform_indices = @transform_1, window_bounds = array<i64: 128, 128>}, {pipeline_mode = #tpu.pipeline_mode<synchronous>, transform_indices = @transform_2, window_bounds = array<i64: 8, 64>}, {pipeline_mode = #tpu.pipeline_mode<synchronous>, transform_indices = @transform_3, window_bounds = array<i64: 1, 64>}, {pipeline_mode = #tpu.pipeline_mode<synchronous>, transform_indices = @transform_4, window_bounds = array<i64: 64, 64>}, {pipeline_mode = #tpu.pipeline_mode<synchronous>, transform_indices = @transform_5, window_bounds = array<i64: 1, 64>}, {pipeline_mode = #tpu.pipeline_mode<synchronous>, transform_indices = @transform_6, window_bounds = array<i64: 64, 128>}, {pipeline_mode = #tpu.pipeline_mode<synchronous>, transform_indices = @transform_7, window_bounds = array<i64: 1, 128>}, {transform_indices = @transform_8, window_bounds = array<i64: 128, 128>}]} {
    %c0 = arith.constant 0 : index
    %c0_0 = arith.constant 0 : index
    %0 = vector.load %arg1[%c0, %c0_0] : memref<128x8xf32, #tpu.memory_space<vmem>>, vector<128x8xf32>
    %c0_1 = arith.constant 0 : index
    %c0_2 = arith.constant 0 : index
    %1 = vector.load %arg3[%c0_1, %c0_2] : memref<8x64xf32, #tpu.memory_space<vmem>>, vector<8x64xf32>
    %cst = arith.constant dense<0.000000e+00> : vector<128x64xf32>
    %2 = tpu.matmul %0, %1, %cst {dimension_numbers = #tpu.dot_dimension_numbers<[1], [0], [0], [1], [0, 0, 1, 1], [], []>} : vector<128x8xf32>, vector<8x64xf32>, vector<128x64xf32> -> vector<128x64xf32>
    %c0_3 = arith.constant 0 : index
    %c0_4 = arith.constant 0 : index
    %3 = vector.load %arg4[%c0_3, %c0_4] : memref<1x64xf32, #tpu.memory_space<vmem>>, vector<1x64xf32>
    %4 = vector.broadcast %3 : vector<1x64xf32> to vector<128x64xf32>
    %5 = arith.addf %2, %4 : vector<128x64xf32>
    %6 = math.tanh %5 : vector<128x64xf32>
    %c0_5 = arith.constant 0 : index
    %c0_6 = arith.constant 0 : index
    %7 = vector.load %arg5[%c0_5, %c0_6] : memref<64x64xf32, #tpu.memory_space<vmem>>, vector<64x64xf32>
    %cst_7 = arith.constant dense<0.000000e+00> : vector<128x64xf32>
    %8 = tpu.matmul %6, %7, %cst_7 {dimension_numbers = #tpu.dot_dimension_numbers<[1], [0], [0], [1], [0, 0, 1, 1], [], []>} : vector<128x64xf32>, vector<64x64xf32>, vector<128x64xf32> -> vector<128x64xf32>
    %c0_8 = arith.constant 0 : index
    %c0_9 = arith.constant 0 : index
    %9 = vector.load %arg6[%c0_8, %c0_9] : memref<1x64xf32, #tpu.memory_space<vmem>>, vector<1x64xf32>
    %10 = vector.broadcast %9 : vector<1x64xf32> to vector<128x64xf32>
    %11 = arith.addf %8, %10 : vector<128x64xf32>
    %12 = math.tanh %11 : vector<128x64xf32>
    %c0_10 = arith.constant 0 : index
    %c0_11 = arith.constant 0 : index
    %13 = vector.load %arg7[%c0_10, %c0_11] : memref<64x128xf32, #tpu.memory_space<vmem>>, vector<64x128xf32>
    %cst_12 = arith.constant dense<0.000000e+00> : vector<128x128xf32>
    %14 = tpu.matmul %12, %13, %cst_12 {dimension_numbers = #tpu.dot_dimension_numbers<[1], [0], [0], [1], [0, 0, 1, 1], [], []>} : vector<128x64xf32>, vector<64x128xf32>, vector<128x128xf32> -> vector<128x128xf32>
    %c0_13 = arith.constant 0 : index
    %c0_14 = arith.constant 0 : index
    %15 = vector.load %arg8[%c0_13, %c0_14] : memref<1x128xf32, #tpu.memory_space<vmem>>, vector<1x128xf32>
    %16 = vector.broadcast %15 : vector<1x128xf32> to vector<128x128xf32>
    %17 = arith.addf %14, %16 : vector<128x128xf32>
    %c0_15 = arith.constant 0 : index
    %c0_16 = arith.constant 0 : index
    %18 = vector.load %arg2[%c0_15, %c0_16] : memref<128x128xf32, #tpu.memory_space<vmem>>, vector<128x128xf32>
    %19 = arith.addf %17, %18 : vector<128x128xf32>
    %cst_17 = arith.constant dense<0xFF800000> : vector<128xf32>
    %20 = vector.multi_reduction <maximumf>, %19, %cst_17 [1] : vector<128x128xf32> to vector<128xf32>
    %21 = vector.shape_cast %20 : vector<128xf32> to vector<128x1xf32>
    %22 = tpu.iota {dimensions = array<i32: 1>} : vector<128x128xi32>
    %23 = vector.broadcast %21 : vector<128x1xf32> to vector<128x128xf32>
    %24 = arith.cmpf oge, %19, %23 : vector<128x128xf32>
    %c128_i32 = arith.constant 128 : i32
    %25 = vector.broadcast %c128_i32 : i32 to vector<128x128xi32>
    %26 = arith.select %24, %22, %25 : vector<128x128xi1>, vector<128x128xi32>
    %cst_18 = arith.constant dense<2147483647> : vector<128xi32>
    %27 = vector.multi_reduction <minsi>, %26, %cst_18 [1] : vector<128x128xi32> to vector<128xi32>
    %28 = vector.shape_cast %27 : vector<128xi32> to vector<128x1xi32>
    %c127_i32 = arith.constant 127 : i32
    %29 = vector.broadcast %c127_i32 : i32 to vector<128x128xi32>
    %30 = arith.cmpi eq, %22, %29 : vector<128x128xi32>
    %31 = arith.sitofp %28 : vector<128x1xi32> to vector<128x1xf32>
    %32 = vector.shape_cast %31 : vector<128x1xf32> to vector<128x1xf32>
    %33 = vector.broadcast %32 : vector<128x1xf32> to vector<128x128xf32>
    %34 = arith.select %30, %33, %17 : vector<128x128xi1>, vector<128x128xf32>
    %c0_19 = arith.constant 0 : index
    %c0_20 = arith.constant 0 : index
    %35 = vector.load %arg9[%c0_19, %c0_20] : memref<128x128xf32, #tpu.memory_space<vmem>>, vector<128x128xf32>
    tpu.vector_store %arg9[%c0_19, %c0_20], %34 {strides = array<i32>} : memref<128x128xf32, #tpu.memory_space<vmem>>, vector<128x128xf32>,
    return
  }
  func.func @transform_0(%arg0: i32) -> (i32, i32) {
    %c0_i32 = arith.constant 0 : i32
    %c0_i32_0 = arith.constant 0 : i32
    return %arg0, %c0_i32 : i32, i32
  }
  func.func @transform_1(%arg0: i32) -> (i32, i32) {
    %c0_i32 = arith.constant 0 : i32
    %c0_i32_0 = arith.constant 0 : i32
    return %arg0, %c0_i32 : i32, i32
  }
  func.func @transform_2(%arg0: i32) -> (i32, i32) {
    %c0_i32 = arith.constant 0 : i32
    %c0_i32_0 = arith.constant 0 : i32
    %c0_i32_1 = arith.constant 0 : i32
    return %c0_i32, %c0_i32_0 : i32, i32
  }
  func.func @transform_3(%arg0: i32) -> (i32, i32) {
    %c0_i32 = arith.constant 0 : i32
    %c0_i32_0 = arith.constant 0 : i32
    %c0_i32_1 = arith.constant 0 : i32
    return %c0_i32, %c0_i32_0 : i32, i32
  }
  func.func @transform_4(%arg0: i32) -> (i32, i32) {
    %c0_i32 = arith.constant 0 : i32
    %c0_i32_0 = arith.constant 0 : i32
    %c0_i32_1 = arith.constant 0 : i32
    return %c0_i32, %c0_i32_0 : i32, i32
  }
  func.func @transform_5(%arg0: i32) -> (i32, i32) {
    %c0_i32 = arith.constant 0 : i32
    %c0_i32_0 = arith.constant 0 : i32
    %c0_i32_1 = arith.constant 0 : i32
    return %c0_i32, %c0_i32_0 : i32, i32
  }
  func.func @transform_6(%arg0: i32) -> (i32, i32) {
    %c0_i32 = arith.constant 0 : i32
    %c0_i32_0 = arith.constant 0 : i32
    %c0_i32_1 = arith.constant 0 : i32
    return %c0_i32, %c0_i32_0 : i32, i32
  }
  func.func @transform_7(%arg0: i32) -> (i32, i32) {
    %c0_i32 = arith.constant 0 : i32
    %c0_i32_0 = arith.constant 0 : i32
    %c0_i32_1 = arith.constant 0 : i32
    return %c0_i32, %c0_i32_0 : i32, i32
  }
  func.func @transform_8(%arg0: i32) -> (i32, i32) {
    %c0_i32 = arith.constant 0 : i32
    %c0_i32_0 = arith.constant 0 : i32
    return %arg0, %c0_i32 : i32, i32
  }
}

</mosaic_0001>

<bundles_post_ra>
// kernel: onnxable_agent_forward.1
= control target key start
LH: loop header
LB: loop body
LE: loop exit
PB: predicated region body
PF: predicated region fallthrough
CT: control target
= control target key end

     0   :  { %vm50_vm0 = vcmask 64512   ;;  %vm192_vm1 = vcmask 523264   ;;  %s1676_s2 = inlined_call_operand.vmem [shape: f32[8,64], index: 2, kind: input, shape index: {}]   ;;  %s1677_s0 = inlined_call_operand.vmem [shape: f32[128,8], index: 0, kind: input, shape index: {}]   ;;  %s1678_s3 = inlined_call_operand.vmem [shape: f32[1,64], index: 3, kind: input, shape index: {}]   ;;  %s1679_s4 = inlined_call_operand.vmem [shape: f32[64,64], index: 4, kind: input, shape index: {}]   ;;  %s1680_s5 = inlined_call_operand.vmem [shape: f32[1,64], index: 5, kind: input, shape index: {}]   ;;  %s1681_s6 = inlined_call_operand.vmem [shape: f32[64,128], index: 6, kind: input, shape index: {}]   ;;  %s1682_s7 = inlined_call_operand.vmem [shape: f32[1,128], index: 7, kind: input, shape index: {}]   ;;  %s1683_s1 = inlined_call_operand.vmem [shape: f32[128,128], index: 1, kind: input, shape index: {}]   ;;  %s1684_s8 = inlined_call_operand.vmem [shape: f32[128,128], index: 8, kind: output, shape index: {}]  }
   0x1   :  { %v45_v0 = vld [vmem:[%s1676_s2] sm:$0xff]  ;;  %v30_v2 = vld [vmem:[%s1677_s0 + $0x8] sm:$0xff]  ;;  %v31_v3 = vld [vmem:[%s1677_s0 + $0x10] sm:$0xff] }
   0x2   :  { %v29_v1 = vld [vmem:[%s1677_s0] sm:$0xff]  ;;  %114 = vmatpush.msra.mxu0 %v45_v0  ;;  %870 = vmatpush.msra.mxu3 %v45_v0  ;;  %v32_v4 = vld [vmem:[%s1677_s0 + $0x18] sm:$0xff]  ;;  %v34_v6 = vld [vmem:[%s1677_s0 + $0x28] sm:$0xff] }
   0x3   :  { %822 = vmatmul.msk.f32.vlgmr.msra.gmra.mxu0 %vm50_vm0, %v29_v1  ;;  %v33_v5 = vld [vmem:[%s1677_s0 + $0x20] sm:$0xff]  ;;  %v35_v7 = vld [vmem:[%s1677_s0 + $0x30] sm:$0xff]  ;;  %v36_v8 = vld [vmem:[%s1677_s0 + $0x38] sm:$0xff] }
   0x4   :  { %v37_v9 = vld [vmem:[%s1677_s0 + $0x40] sm:$0xff]  ;;  %v42_v10 = vld [vmem:[%s1677_s0 + $0x68] sm:$0xff]  ;;  %v187_v11 = vld [vmem:[%s1679_s4 + $0x38] sm:$0xff] }
   0x5   :  { %835 = vmatmul.msk.f32.vlgmr.msra.gmra.mxu3 %vm50_vm0, %v42_v10  ;;  %v186_v12 = vld [vmem:[%s1679_s4 + $0x30] sm:$0xff]  ;;  %249 = vmatpush.msra.mxu1 %v187_v11  ;;  %v185_v13 = vld [vmem:[%s1679_s4 + $0x28] sm:$0xff]  ;;  %v44_v17 = vld [vmem:[%s1677_s0 + $0x78] sm:$0xff] }
   0x6   :  { %871 = vmatpush.msrb.mxu3 %v187_v11  ;;  %v38_v14 = vld [vmem:[%s1677_s0 + $0x48] sm:$0xff]  ;;  %v43_v15 = vld [vmem:[%s1677_s0 + $0x70] sm:$0xff]  ;;  %v40_v18 = vld [vmem:[%s1677_s0 + $0x58] sm:$0xff] }
   0x7   :  { %250 = vmatpush.msra.mxu1 %v186_v12  ;;  %v39_v16 = vld [vmem:[%s1677_s0 + $0x50] sm:$0xff]  ;;  %v41_v19 = vld [vmem:[%s1677_s0 + $0x60] sm:$0xff]  ;;  %v183_v21 = vld [vmem:[%s1679_s4 + $0x18] sm:$0xff] }
   0x8   :  { %872 = vmatpush.msrb.mxu3 %v186_v12  ;;  %v184_v20 = vld [vmem:[%s1679_s4 + $0x20] sm:$0xff]  ;;  %v182_v22 = vld [vmem:[%s1679_s4 + $0x10] sm:$0xff]  ;;  %v181_v23 = vld [vmem:[%s1679_s4 + $0x8] sm:$0xff] }
   0x9   :  { %251 = vmatpush.msra.mxu1 %v185_v13  ;;  %v180_v24 = vld [vmem:[%s1679_s4] sm:$0xff]  ;;  %v329_v1 = vld [vmem:[%s1681_s6 + $0x38] sm:$0xff]  ;;  %v323_v10 = vld [vmem:[%s1681_s6 + $0x8] sm:$0xff] }
   0xa   :  { %873 = vmatpush.msrb.mxu3 %v185_v13  ;;  %v1093_v25 = vld [vmem:[%s1678_s3] ss:$0 sm:$0xff]  ;;  %390 = vmatpush.msra.mxu2 %v329_v1 }
   0xb   :  { %823 = vmatmul.msk.f32.gmra.mxu0 %vm50_vm0, %v30_v2  ;;  %252 = vmatpush.msra.mxu1 %v184_v20  ;;  %v328_v2 = vld [vmem:[%s1681_s6 + $0x30] sm:$0xff]  ;;  %v322_v13 = vld [vmem:[%s1681_s6] sm:$0xff] }
   0xc   :  { %874 = vmatpush.msrb.mxu3 %v184_v20  ;;  %391 = vmatpush.msra.mxu2 %v328_v2 }
   0xd   :  { %836 = vmatmul.msk.f32.gmra.mxu3 %vm50_vm0, %v43_v15  ;;  %253 = vmatpush.msra.mxu1 %v183_v21 }
   0xe   :  { %875 = vmatpush.msrb.mxu3 %v183_v21 }
   0xf   :  { %254 = vmatpush.msra.mxu1 %v182_v22 }
  0x10   :  { %876 = vmatpush.msrb.mxu3 %v182_v22 }
  0x11   :  { %255 = vmatpush.msra.mxu1 %v181_v23 }
  0x12   :  { %877 = vmatpush.msrb.mxu3 %v181_v23 }
  0x13   :  { %824 = vmatmul.msk.f32.gmra.mxu0 %vm50_vm0, %v31_v3  ;;  %256 = vmatpush.msra.mxu1 %v180_v24  ;;  %v327_v3 = vld [vmem:[%s1681_s6 + $0x28] sm:$0xff] }
  0x14   :  { %878 = vmatpush.msrb.mxu3 %v180_v24  ;;  %392 = vmatpush.msra.mxu2 %v327_v3 }
  0x15   :  { %837 = vmatmul.msk.f32.gmra.mxu3 %vm50_vm0, %v44_v17 }
  0x16   :  { %879 = vmatpush.msra.mxu3 %v329_v1 }
  0x18   :  { %880 = vmatpush.msra.mxu3 %v328_v2 }
  0x1a   :  { %881 = vmatpush.msra.mxu3 %v327_v3  ;;  %v1191_v3 = vld [vmem:[%s1682_s7] ss:$0 sm:$0xff] }
  0x1b   :  { %825 = vmatmul.msk.f32.gmra.mxu0 %vm50_vm0, %v32_v4 }
  0x23   :  { %826 = vmatmul.msk.f32.gmra.mxu0 %vm50_vm0, %v33_v5  ;;  %v326_v5 = vld [vmem:[%s1681_s6 + $0x20] sm:$0xff] }
  0x24   :  { %393 = vmatpush.msra.mxu2 %v326_v5  ;;  %882 = vmatpush.msra.mxu3 %v326_v5  ;;  %v447_v5 = vld [vmem:[%s1683_s1] sm:$0xff] }
  0x2b   :  { %827 = vmatmul.msk.f32.gmra.mxu0 %vm50_vm0, %v34_v6 }
  0x33   :  { %828 = vmatmul.msk.f32.gmra.mxu0 %vm50_vm0, %v35_v7 }
  0x3b   :  { %829 = vmatmul.msk.f32.gmra.mxu0 %vm50_vm0, %v36_v8  ;;  %v325_v8 = vld [vmem:[%s1681_s6 + $0x18] sm:$0xff] }
  0x3c   :  { %394 = vmatpush.msra.mxu2 %v325_v8  ;;  %883 = vmatpush.msra.mxu3 %v325_v8 }
  0x43   :  { %830 = vmatmul.msk.f32.gmra.mxu0 %vm50_vm0, %v37_v9  ;;  %v324_v9 = vld [vmem:[%s1681_s6 + $0x10] sm:$0xff] }
  0x44   :  { %395 = vmatpush.msra.mxu2 %v324_v9  ;;  %884 = vmatpush.msra.mxu3 %v324_v9  ;;  %v448_v9 = vld [vmem:[%s1683_s1 + $0x8] sm:$0xff] }
  0x46   :  { %396 = vmatpush.msra.mxu2 %v323_v10  ;;  %885 = vmatpush.msra.mxu3 %v323_v10 }
  0x48   :  { %397 = vmatpush.msra.mxu2 %v322_v13  ;;  %886 = vmatpush.msra.mxu3 %v322_v13  ;;  %v449_v13 = vld [vmem:[%s1683_s1 + $0x10] sm:$0xff] }
  0x4b   :  { %831 = vmatmul.msk.f32.gmra.mxu0 %vm50_vm0, %v38_v14 }
  0x53   :  { %832 = vmatmul.msk.f32.gmra.mxu0 %vm50_vm0, %v39_v16 }
  0x5b   :  { %833 = vmatmul.msk.f32.gmra.mxu0 %vm50_vm0, %v40_v18  ;;  %v1154_v18 = vld [vmem:[%s1680_s5] ss:$0 sm:$0xff] }
  0x63   :  { %834 = vmatmul.msk.f32.gmra.mxu0 %vm50_vm0, %v41_v19 }
  0x80   :  { %v116_v26 = vpop.f32.mrf.mxu0 }
  0x81   :  { %v117_v27 = vadd.f32 %v1093_v25, %v116_v26 }
  0x83   :  { %890 = vtanh.f32 %v117_v27 }
  0x88   :  { %v119_v28 = vpop.f32.mrf.mxu0  ;;  %v155_v61 = vpop.f32.mrf.mxu3 }
  0x89   :  { %v891_v29 = vpop.eup %890  ;;  %v120_v30 = vadd.f32 %v1093_v25, %v119_v28  ;;  %v156_v4 = vadd.f32 %v1093_v25, %v155_v61 }
  0x8a   :  { %838 = vmatmul.msk.f32.vlgmr.msra.gmra.mxu1 %vm192_vm1, %v891_v29 }
  0x8b   :  { %892 = vtanh.f32 %v120_v30 }
  0x90   :  { %v122_v31 = vpop.f32.mrf.mxu0  ;;  %v158_v6 = vpop.f32.mrf.mxu3 }
  0x91   :  { %v893_v32 = vpop.eup %892  ;;  %v123_v33 = vadd.f32 %v1093_v25, %v122_v31  ;;  %v159_v11 = vadd.f32 %v1093_v25, %v158_v6 }
  0x92   :  { %839 = vmatmul.msk.f32.gmra.mxu1 %vm192_vm1, %v893_v32 }
  0x93   :  { %894 = vtanh.f32 %v123_v33 }
  0x98   :  { %v125_v34 = vpop.f32.mrf.mxu0  ;;  %v161_v14 = vpop.f32.mrf.mxu3 }
  0x99   :  { %v895_v35 = vpop.eup %894  ;;  %v126_v36 = vadd.f32 %v1093_v25, %v125_v34  ;;  %v162_v15 = vadd.f32 %v1093_v25, %v161_v14 }
  0x9a   :  { %840 = vmatmul.msk.f32.gmra.mxu1 %vm192_vm1, %v895_v35 }
  0x9b   :  { %896 = vtanh.f32 %v126_v36 }
  0xa0   :  { %v128_v37 = vpop.f32.mrf.mxu0 }
  0xa1   :  { %v897_v38 = vpop.eup %896  ;;  %v129_v39 = vadd.f32 %v1093_v25, %v128_v37 }
  0xa2   :  { %841 = vmatmul.msk.f32.gmra.mxu1 %vm192_vm1, %v897_v38 }
  0xa3   :  { %898 = vtanh.f32 %v129_v39 }
  0xa8   :  { %v131_v40 = vpop.f32.mrf.mxu0 }
  0xa9   :  { %v899_v41 = vpop.eup %898  ;;  %v132_v42 = vadd.f32 %v1093_v25, %v131_v40 }
  0xaa   :  { %842 = vmatmul.msk.f32.gmra.mxu1 %vm192_vm1, %v899_v41 }
  0xab   :  { %900 = vtanh.f32 %v132_v42 }
  0xb0   :  { %v134_v43 = vpop.f32.mrf.mxu0 }
  0xb1   :  { %v901_v44 = vpop.eup %900  ;;  %v135_v45 = vadd.f32 %v1093_v25, %v134_v43 }
  0xb2   :  { %843 = vmatmul.msk.f32.gmra.mxu1 %vm192_vm1, %v901_v44 }
  0xb3   :  { %902 = vtanh.f32 %v135_v45 }
  0xb8   :  { %v137_v46 = vpop.f32.mrf.mxu0 }
  0xb9   :  { %v903_v47 = vpop.eup %902  ;;  %v138_v48 = vadd.f32 %v1093_v25, %v137_v46 }
  0xba   :  { %844 = vmatmul.msk.f32.gmra.mxu1 %vm192_vm1, %v903_v47 }
  0xbb   :  { %904 = vtanh.f32 %v138_v48 }
  0xc0   :  { %v140_v49 = vpop.f32.mrf.mxu0 }
  0xc1   :  { %v905_v50 = vpop.eup %904  ;;  %v141_v51 = vadd.f32 %v1093_v25, %v140_v49 }
  0xc2   :  { %845 = vmatmul.msk.f32.gmra.mxu1 %vm192_vm1, %v905_v50 }
  0xc3   :  { %906 = vtanh.f32 %v141_v51 }
  0xc8   :  { %v143_v52 = vpop.f32.mrf.mxu0 }
  0xc9   :  { %v907_v53 = vpop.eup %906  ;;  %v144_v54 = vadd.f32 %v1093_v25, %v143_v52 }
  0xca   :  { %846 = vmatmul.msk.f32.gmra.mxu1 %vm192_vm1, %v907_v53 }
  0xcb   :  { %908 = vtanh.f32 %v144_v54 }
  0xd0   :  { %v146_v55 = vpop.f32.mrf.mxu0 }
  0xd1   :  { %v909_v56 = vpop.eup %908  ;;  %v147_v57 = vadd.f32 %v1093_v25, %v146_v55 }
  0xd2   :  { %847 = vmatmul.msk.f32.gmra.mxu1 %vm192_vm1, %v909_v56 }
  0xd3   :  { %910 = vtanh.f32 %v147_v57 }
  0xd8   :  { %v149_v58 = vpop.f32.mrf.mxu0 }
  0xd9   :  { %v911_v59 = vpop.eup %910  ;;  %v150_v60 = vadd.f32 %v1093_v25, %v149_v58 }
  0xda   :  { %848 = vmatmul.msk.f32.gmra.mxu1 %vm192_vm1, %v911_v59 }
  0xdb   :  { %912 = vtanh.f32 %v150_v60 }
  0xe0   :  { %v152_v62 = vpop.f32.mrf.mxu0 }
  0xe1   :  { %v913_v63 = vpop.eup %912  ;;  %v153_v0 = vadd.f32 %v1093_v25, %v152_v62 }
  0xe2   :  { %849 = vmatmul.msk.f32.gmra.mxu1 %vm192_vm1, %v913_v63 }
  0xe3   :  { %914 = vtanh.f32 %v153_v0 }
  0xe4   :  { %916 = vtanh.f32 %v156_v4 }
  0xe5   :  { %918 = vtanh.f32 %v159_v11 }
  0xe6   :  { %920 = vtanh.f32 %v162_v15 }
  0xe9   :  { %v915_v7 = vpop.eup %914 }
  0xea   :  { %850 = vmatmul.msk.f32.vlgmr.msrb.gmra.mxu3 %vm192_vm1, %v915_v7  ;;  %v917_v12 = vpop.eup %916 }
  0xeb   :  { %v919_v16 = vpop.eup %918 }
  0xec   :  { %v921_v17 = vpop.eup %920 }
  0xf2   :  { %851 = vmatmul.msk.f32.gmra.mxu3 %vm192_vm1, %v917_v12 }
  0xfa   :  { %852 = vmatmul.msk.f32.gmra.mxu3 %vm192_vm1, %v919_v16 }
 0x102   :  { %853 = vmatmul.msk.f32.gmra.mxu3 %vm192_vm1, %v921_v17  ;;  %v450_v17 = vld [vmem:[%s1683_s1 + $0x18] sm:$0xff] }
 0x107   :  { %v258_v19 = vpop.f32.mrf.mxu1 }
 0x108   :  { %v259_v20 = vadd.f32 %v1154_v18, %v258_v19 }
 0x10a   :  { %922 = vtanh.f32 %v259_v20 }
 0x10f   :  { %v261_v21 = vpop.f32.mrf.mxu1 }
 0x110   :  { %v923_v22 = vpop.eup %922  ;;  %v262_v23 = vadd.f32 %v1154_v18, %v261_v21  ;;  %v451_v21 = vld [vmem:[%s1683_s1 + $0x20] sm:$0xff] }
 0x111   :  { %854 = vmatmul.msk.f32.vlgmr.msra.gmra.mxu2 %vm192_vm1, %v923_v22 }
 0x112   :  { %924 = vtanh.f32 %v262_v23 }
 0x117   :  { %v264_v24 = vpop.f32.mrf.mxu1 }
 0x118   :  { %v925_v25 = vpop.eup %924  ;;  %v265_v26 = vadd.f32 %v1154_v18, %v264_v24 }
 0x119   :  { %855 = vmatmul.msk.f32.gmra.mxu2 %vm192_vm1, %v925_v25  ;;  %v452_v25 = vld [vmem:[%s1683_s1 + $0x28] sm:$0xff] }
 0x11a   :  { %926 = vtanh.f32 %v265_v26 }
 0x11f   :  { %v267_v27 = vpop.f32.mrf.mxu1 }
 0x120   :  { %v927_v28 = vpop.eup %926  ;;  %v268_v29 = vadd.f32 %v1154_v18, %v267_v27 }
 0x121   :  { %856 = vmatmul.msk.f32.gmra.mxu2 %vm192_vm1, %v927_v28 }
 0x122   :  { %928 = vtanh.f32 %v268_v29  ;;  %v453_v29 = vld [vmem:[%s1683_s1 + $0x30] sm:$0xff] }
 0x127   :  { %v270_v30 = vpop.f32.mrf.mxu1 }
 0x128   :  { %v929_v31 = vpop.eup %928  ;;  %v271_v32 = vadd.f32 %v1154_v18, %v270_v30 }
 0x129   :  { %857 = vmatmul.msk.f32.gmra.mxu2 %vm192_vm1, %v929_v31 }
 0x12a   :  { %930 = vtanh.f32 %v271_v32 }
 0x12f   :  { %v273_v33 = vpop.f32.mrf.mxu1 }
 0x130   :  { %v931_v34 = vpop.eup %930  ;;  %v274_v35 = vadd.f32 %v1154_v18, %v273_v33  ;;  %v454_v33 = vld [vmem:[%s1683_s1 + $0x38] sm:$0xff] }
 0x131   :  { %858 = vmatmul.msk.f32.gmra.mxu2 %vm192_vm1, %v931_v34 }
 0x132   :  { %932 = vtanh.f32 %v274_v35 }
 0x137   :  { %v276_v36 = vpop.f32.mrf.mxu1 }
 0x138   :  { %v933_v37 = vpop.eup %932  ;;  %v277_v38 = vadd.f32 %v1154_v18, %v276_v36 }
 0x139   :  { %859 = vmatmul.msk.f32.gmra.mxu2 %vm192_vm1, %v933_v37  ;;  %v455_v37 = vld [vmem:[%s1683_s1 + $0x40] sm:$0xff] }
 0x13a   :  { %934 = vtanh.f32 %v277_v38 }
 0x13f   :  { %v279_v39 = vpop.f32.mrf.mxu1 }
 0x140   :  { %v935_v40 = vpop.eup %934  ;;  %v280_v41 = vadd.f32 %v1154_v18, %v279_v39 }
 0x141   :  { %860 = vmatmul.msk.f32.gmra.mxu2 %vm192_vm1, %v935_v40 }
 0x142   :  { %936 = vtanh.f32 %v280_v41  ;;  %v456_v41 = vld [vmem:[%s1683_s1 + $0x48] sm:$0xff] }
 0x147   :  { %v282_v42 = vpop.f32.mrf.mxu1 }
 0x148   :  { %v937_v43 = vpop.eup %936  ;;  %v283_v44 = vadd.f32 %v1154_v18, %v282_v42 }
 0x149   :  { %861 = vmatmul.msk.f32.gmra.mxu2 %vm192_vm1, %v937_v43 }
 0x14a   :  { %938 = vtanh.f32 %v283_v44 }
 0x14f   :  { %v285_v45 = vpop.f32.mrf.mxu1 }
 0x150   :  { %v939_v46 = vpop.eup %938  ;;  %v286_v47 = vadd.f32 %v1154_v18, %v285_v45  ;;  %v457_v45 = vld [vmem:[%s1683_s1 + $0x50] sm:$0xff] }
 0x151   :  { %862 = vmatmul.msk.f32.gmra.mxu2 %vm192_vm1, %v939_v46 }
 0x152   :  { %940 = vtanh.f32 %v286_v47 }
 0x157   :  { %v288_v48 = vpop.f32.mrf.mxu1 }
 0x158   :  { %v941_v49 = vpop.eup %940  ;;  %v289_v50 = vadd.f32 %v1154_v18, %v288_v48 }
 0x159   :  { %863 = vmatmul.msk.f32.gmra.mxu2 %vm192_vm1, %v941_v49  ;;  %v458_v49 = vld [vmem:[%s1683_s1 + $0x58] sm:$0xff] }
 0x15a   :  { %942 = vtanh.f32 %v289_v50 }
 0x15f   :  { %v291_v51 = vpop.f32.mrf.mxu1 }
 0x160   :  { %v943_v52 = vpop.eup %942  ;;  %v292_v53 = vadd.f32 %v1154_v18, %v291_v51 }
 0x161   :  { %864 = vmatmul.msk.f32.gmra.mxu2 %vm192_vm1, %v943_v52 }
 0x162   :  { %944 = vtanh.f32 %v292_v53  ;;  %v459_v53 = vld [vmem:[%s1683_s1 + $0x60] sm:$0xff] }
 0x168   :  { %v945_v54 = vpop.eup %944 }
 0x169   :  { %865 = vmatmul.msk.f32.gmra.mxu2 %vm192_vm1, %v945_v54 }
 0x16d   :  { %v294_v55 = vpop.f32.mrf.mxu3 }
 0x16e   :  { %v295_v56 = vadd.f32 %v1154_v18, %v294_v55 }
 0x170   :  { %946 = vtanh.f32 %v295_v56 }
 0x175   :  { %v297_v57 = vpop.f32.mrf.mxu3 }
 0x176   :  { %v947_v58 = vpop.eup %946  ;;  %v298_v59 = vadd.f32 %v1154_v18, %v297_v57  ;;  %v460_v57 = vld [vmem:[%s1683_s1 + $0x68] sm:$0xff] }
 0x177   :  { %866 = vmatmul.msk.f32.vlgmr.msra.gmra.mxu3 %vm192_vm1, %v947_v58 }
 0x178   :  { %948 = vtanh.f32 %v298_v59 }
 0x17d   :  { %v300_v60 = vpop.f32.mrf.mxu3 }
 0x17e   :  { %v949_v61 = vpop.eup %948  ;;  %v301_v62 = vadd.f32 %v1154_v18, %v300_v60  ;;  %v511_v60 = vlaneseq }
 0x17f   :  { %867 = vmatmul.msk.f32.gmra.mxu3 %vm192_vm1, %v949_v61 }
 0x180   :  { %950 = vtanh.f32 %v301_v62  ;;  %v1333_v62 = vand.u32 127, %v511_v60 }
 0x185   :  { %v303_v63 = vpop.f32.mrf.mxu3 }
 0x186   :  { %v951_v0 = vpop.eup %950  ;;  %v304_v1 = vadd.f32 %v1154_v18, %v303_v63  ;;  %v461_v63 = vld [vmem:[%s1683_s1 + $0x70] sm:$0xff] }
 0x187   :  { %868 = vmatmul.msk.f32.gmra.mxu3 %vm192_vm1, %v951_v0 }
 0x188   :  { %952 = vtanh.f32 %v304_v1 }
 0x18e   :  { %v953_v2 = vpop.eup %952 }
 0x18f   :  { %869 = vmatmul.msk.f32.gmra.mxu3 %vm192_vm1, %v953_v2 }
 0x194   :  { %v399_v4 = vpop.f32.mrf.mxu2 }
 0x195   :  { %v1197_v6 = vadd.f32 %v1191_v3, %v399_v4 }
 0x197   :  { %v1200_v7 = vadd.f32 %v447_v5, %v1197_v6 }
 0x199   :  { %479 = vmax.xlane.f32.xlu0 %v1200_v7 }
 0x19c   :  { %v402_v8 = vpop.f32.mrf.mxu2 }
 0x19d   :  { %v1207_v10 = vadd.f32 %v1191_v3, %v402_v8 }
 0x19f   :  { %v1210_v11 = vadd.f32 %v448_v9, %v1207_v10 }
 0x1a1   :  { %481 = vmax.xlane.f32.xlu0 %v1210_v11 }
 0x1a4   :  { %v405_v12 = vpop.f32.mrf.mxu2 }
 0x1a5   :  { %v1217_v14 = vadd.f32 %v1191_v3, %v405_v12  ;;  %v462_v12 = vld [vmem:[%s1683_s1 + $0x78] sm:$0xff] }
 0x1a7   :  { %v1220_v15 = vadd.f32 %v449_v13, %v1217_v14 }
 0x1a9   :  { %483 = vmax.xlane.f32.xlu1 %v1220_v15 }
 0x1ac   :  { %v408_v16 = vpop.f32.mrf.mxu2 }
 0x1ad   :  { %v1227_v18 = vadd.f32 %v1191_v3, %v408_v16 }
 0x1af   :  { %v1230_v19 = vadd.f32 %v450_v17, %v1227_v18 }
 0x1b1   :  { %485 = vmax.xlane.f32.xlu1 %v1230_v19 }
 0x1b4   :  { %v411_v20 = vpop.f32.mrf.mxu2 }
 0x1b5   :  { %v1237_v22 = vadd.f32 %v1191_v3, %v411_v20 }
 0x1b7   :  { %v1240_v23 = vadd.f32 %v451_v21, %v1237_v22 }
 0x1b9   :  { %487 = vmax.xlane.f32.xlu2 %v1240_v23 }
 0x1bc   :  { %v414_v24 = vpop.f32.mrf.mxu2 }
 0x1bd   :  { %v1247_v26 = vadd.f32 %v1191_v3, %v414_v24 }
 0x1bf   :  { %v1250_v27 = vadd.f32 %v452_v25, %v1247_v26 }
 0x1c1   :  { %489 = vmax.xlane.f32.xlu2 %v1250_v27 }
 0x1c4   :  { %v417_v28 = vpop.f32.mrf.mxu2 }
 0x1c5   :  { %v1257_v30 = vadd.f32 %v1191_v3, %v417_v28 }
 0x1c7   :  { %v1260_v31 = vadd.f32 %v453_v29, %v1257_v30 }
 0x1c9   :  { %491 = vmax.xlane.f32.xlu0 %v1260_v31 }
 0x1cc   :  { %v420_v32 = vpop.f32.mrf.mxu2 }
 0x1cd   :  { %v1267_v34 = vadd.f32 %v1191_v3, %v420_v32 }
 0x1cf   :  { %v1270_v35 = vadd.f32 %v454_v33, %v1267_v34 }
 0x1d1   :  { %493 = vmax.xlane.f32.xlu1 %v1270_v35 }
 0x1d4   :  { %v423_v36 = vpop.f32.mrf.mxu2 }
 0x1d5   :  { %v1277_v38 = vadd.f32 %v1191_v3, %v423_v36 }
 0x1d7   :  { %v1280_v39 = vadd.f32 %v455_v37, %v1277_v38 }
 0x1d9   :  { %495 = vmax.xlane.f32.xlu2 %v1280_v39 }
 0x1dc   :  { %v426_v40 = vpop.f32.mrf.mxu2 }
 0x1dd   :  { %v1287_v42 = vadd.f32 %v1191_v3, %v426_v40 }
 0x1df   :  { %v1290_v43 = vadd.f32 %v456_v41, %v1287_v42 }
 0x1e1   :  { %497 = vmax.xlane.f32.xlu0 %v1290_v43 }
 0x1e4   :  { %v429_v44 = vpop.f32.mrf.mxu2 }
 0x1e5   :  { %v1297_v46 = vadd.f32 %v1191_v3, %v429_v44 }
 0x1e7   :  { %v1300_v47 = vadd.f32 %v457_v45, %v1297_v46 }
 0x1e9   :  { %499 = vmax.xlane.f32.xlu1 %v1300_v47 }
 0x1ec   :  { %v432_v48 = vpop.f32.mrf.mxu2 }
 0x1ed   :  { %v1307_v50 = vadd.f32 %v1191_v3, %v432_v48 }
 0x1ef   :  { %v1310_v51 = vadd.f32 %v458_v49, %v1307_v50 }
 0x1f1   :  { %501 = vmax.xlane.f32.xlu2 %v1310_v51 }
 0x1fa   :  { %v435_v52 = vpop.f32.mrf.mxu3 }
 0x1fb   :  { %v1317_v54 = vadd.f32 %v1191_v3, %v435_v52 }
 0x1fd   :  { %v1320_v55 = vadd.f32 %v459_v53, %v1317_v54 }
 0x1ff   :  { %503 = vmax.xlane.f32.xlu0 %v1320_v55 }
 0x202   :  { %v438_v56 = vpop.f32.mrf.mxu3 }
 0x203   :  { %v1327_v58 = vadd.f32 %v1191_v3, %v438_v56 }
 0x205   :  { %v1330_v59 = vadd.f32 %v460_v57, %v1327_v58 }
 0x207   :  { %505 = vmax.xlane.f32.xlu1 %v1330_v59 }
 0x20a   :  { %v441_v61 = vpop.f32.mrf.mxu3 }
 0x20b   :  { %v1339_v0 = vadd.f32 %v1191_v3, %v441_v61 }
 0x20c   :  { %v480_v1 = vpop.xlane.xlu0 %479 }
 0x20d   :  { %vm513_vm2 = vcmp.ge.f32.partialorder %v1200_v7, %v480_v1  ;;  %v1343_v2 = vadd.f32 %v461_v63, %v1339_v0 }
 0x20e   :  { %v1346_v4 = vsel %vm513_vm2, %v1333_v62, 128 }
 0x20f   :  { %507 = vmax.xlane.f32.xlu2 %v1343_v2  ;;  %v546_v5 = vshra.s32 %v1346_v4, 16 }
 0x211   :  { %v1350_v8 = vcvt.s32.f32 %v546_v5 }
 0x212   :  { %v444_v9 = vpop.f32.mrf.mxu3 }
 0x213   :  { %v1356_v13 = vadd.f32 %v1191_v3, %v444_v9  ;;  %549 = vmin.xlane.f32.xlu1 %v1350_v8 }
 0x214   :  { %v482_v7 = vpop.xlane.xlu0 %481 }
 0x215   :  { %vm514_vm3 = vcmp.ge.f32.partialorder %v1210_v11, %v482_v7  ;;  %v1361_v16 = vadd.f32 %v462_v12, %v1356_v13 }
 0x216   :  { %v1364_v17 = vsel %vm514_vm3, %v1333_v62, 128 }
 0x217   :  { %509 = vmax.xlane.f32.xlu0 %v1361_v16  ;;  %v560_v20 = vshra.s32 %v1364_v17, 16 }
 0x219   :  { %v1369_v3 = vcvt.s32.f32 %v560_v20 }
 0x21c   :  { %v484_v21 = vpop.xlane.xlu1 %483 }
 0x21d   :  { %vm515_vm4 = vcmp.ge.f32.partialorder %v1220_v15, %v484_v21 }
 0x21e   :  { %v1372_v24 = vsel %vm515_vm4, %v1333_v62, 128 }
 0x21f   :  { %563 = vmin.xlane.f32.xlu0 %v1369_v3  ;;  %v574_v11 = vshra.s32 %v1372_v24, 16 }
 0x221   :  { %v1376_v25 = vcvt.s32.f32 %v574_v11 }
 0x223   :  { %577 = vmin.xlane.f32.xlu1 %v1376_v25 }
 0x224   :  { %v486_v28 = vpop.xlane.xlu1 %485 }
 0x225   :  { %vm516_vm5 = vcmp.ge.f32.partialorder %v1230_v19, %v486_v28 }
 0x226   :  { %v1381_v29 = vsel %vm516_vm5, %v1333_v62, 128 }
 0x227   :  { %v588_v15 = vshra.s32 %v1381_v29, 16 }
 0x229   :  { %v1384_v32 = vcvt.s32.f32 %v588_v15 }
 0x22b   :  { %591 = vmin.xlane.f32.xlu2 %v1384_v32 }
 0x22c   :  { %v488_v33 = vpop.xlane.xlu2 %487 }
 0x22d   :  { %vm517_vm6 = vcmp.ge.f32.partialorder %v1240_v23, %v488_v33 }
 0x22e   :  { %v1389_v36 = vsel %vm517_vm6, %v1333_v62, 128 }
 0x22f   :  { %v602_v37 = vshra.s32 %v1389_v36, 16 }
 0x231   :  { %v1392_v40 = vcvt.s32.f32 %v602_v37 }
 0x233   :  { %605 = vmin.xlane.f32.xlu0 %v1392_v40 }
 0x234   :  { %v490_v19 = vpop.xlane.xlu2 %489 }
 0x235   :  { %vm518_vm7 = vcmp.ge.f32.partialorder %v1250_v27, %v490_v19 }
 0x236   :  { %v1397_v41 = vsel %vm518_vm7, %v1333_v62, 128 }
 0x237   :  { %v616_v44 = vshra.s32 %v1397_v41, 16 }
 0x239   :  { %v1400_v45 = vcvt.s32.f32 %v616_v44 }
 0x23b   :  { %619 = vmin.xlane.f32.xlu1 %v1400_v45 }
 0x23c   :  { %v492_v23 = vpop.xlane.xlu0 %491 }
 0x23d   :  { %vm519_vm8 = vcmp.ge.f32.partialorder %v1260_v31, %v492_v23 }
 0x23e   :  { %v1405_v48 = vsel %vm519_vm8, %v1333_v62, 128 }
 0x23f   :  { %v630_v49 = vshra.s32 %v1405_v48, 16 }
 0x241   :  { %v1408_v52 = vcvt.s32.f32 %v630_v49 }
 0x243   :  { %633 = vmin.xlane.f32.xlu2 %v1408_v52 }
 0x244   :  { %v494_v27 = vpop.xlane.xlu1 %493 }
 0x245   :  { %vm520_vm9 = vcmp.ge.f32.partialorder %v1270_v35, %v494_v27 }
 0x246   :  { %v1413_v53 = vsel %vm520_vm9, %v1333_v62, 128 }
 0x247   :  { %v644_v56 = vshra.s32 %v1413_v53, 16 }
 0x249   :  { %v1416_v57 = vcvt.s32.f32 %v644_v56 }
 0x24b   :  { %647 = vmin.xlane.f32.xlu0 %v1416_v57 }
 0x24c   :  { %v496_v31 = vpop.xlane.xlu2 %495 }
 0x24d   :  { %vm521_vm10 = vcmp.ge.f32.partialorder %v1280_v39, %v496_v31 }
 0x24e   :  { %v1421_v60 = vsel %vm521_vm10, %v1333_v62, 128 }
 0x24f   :  { %v658_v61 = vshra.s32 %v1421_v60, 16 }
 0x251   :  { %v1424_v63 = vcvt.s32.f32 %v658_v61 }
 0x253   :  { %661 = vmin.xlane.f32.xlu1 %v1424_v63 }
 0x254   :  { %v498_v35 = vpop.xlane.xlu0 %497 }
 0x255   :  { %vm522_vm11 = vcmp.ge.f32.partialorder %v1290_v43, %v498_v35 }
 0x256   :  { %v1429_v1 = vsel %vm522_vm11, %v1333_v62, 128 }
 0x257   :  { %v672_v5 = vshra.s32 %v1429_v1, 16 }
 0x259   :  { %v1432_v9 = vcvt.s32.f32 %v672_v5 }
 0x25b   :  { %675 = vmin.xlane.f32.xlu2 %v1432_v9 }
 0x25c   :  { %v500_v39 = vpop.xlane.xlu1 %499 }
 0x25d   :  { %vm523_vm12 = vcmp.ge.f32.partialorder %v1300_v47, %v500_v39  ;;  %v559_v39 = vand.u32 65535, %v1364_v17 }
 0x25e   :  { %v1437_v12 = vsel %vm523_vm12, %v1333_v62, 128 }
 0x25f   :  { %v686_v7 = vshra.s32 %v1437_v12, 16 }
 0x261   :  { %v1440_v20 = vcvt.s32.f32 %v686_v7 }
 0x263   :  { %689 = vmin.xlane.f32.xlu0 %v1440_v20 }
 0x264   :  { %v502_v43 = vpop.xlane.xlu2 %501 }
 0x265   :  { %vm524_vm13 = vcmp.ge.f32.partialorder %v1310_v51, %v502_v43 }
 0x266   :  { %v1445_v21 = vsel %vm524_vm13, %v1333_v62, 128 }
 0x267   :  { %v700_v11 = vshra.s32 %v1445_v21, 16 }
 0x269   :  { %v1448_v28 = vcvt.s32.f32 %v700_v11  ;;  %v561_v11 = vcvt.s32.f32 %v559_v39 }
 0x26b   :  { %703 = vmin.xlane.f32.xlu1 %v1448_v28 }
 0x272   :  { %v504_v47 = vpop.xlane.xlu0 %503 }
 0x273   :  { %vm525_vm14 = vcmp.ge.f32.partialorder %v1320_v55, %v504_v47  ;;  %v545_v55 = vand.u32 65535, %v1346_v4 }
 0x274   :  { %v1453_v15 = vsel %vm525_vm14, %v1333_v62, 128 }
 0x275   :  { %v714_v33 = vshra.s32 %v1453_v15, 16  ;;  %v547_v31 = vcvt.s32.f32 %v545_v55 }
 0x277   :  { %v1456_v37 = vcvt.s32.f32 %v714_v33 }
 0x279   :  { %717 = vmin.xlane.f32.xlu2 %v1456_v37 }
 0x27a   :  { %v506_v51 = vpop.xlane.xlu1 %505 }
 0x27b   :  { %vm526_vm15 = vcmp.ge.f32.partialorder %v1330_v59, %v506_v51  ;;  %v587_v51 = vand.u32 65535, %v1381_v29  ;;  %v615_v29 = vand.u32 65535, %v1397_v41  ;;  %v643_v41 = vand.u32 65535, %v1413_v53 }
 0x27c   :  { %v1461_v19 = vsel %vm526_vm15, %v1333_v62, 128  ;;  %v671_v53 = vand.u32 65535, %v1429_v1  ;;  %v699_v1 = vand.u32 65535, %v1445_v21 }
 0x27d   :  { %v728_v44 = vshra.s32 %v1461_v19, 16  ;;  %v727_v21 = vand.u32 65535, %v1461_v19 }
 0x27f   :  { %v1464_v23 = vcvt.s32.f32 %v728_v44 }
 0x281   :  { %731 = vmin.xlane.f32.xlu0 %v1464_v23 }
 0x282   :  { %v508_v49 = vpop.xlane.xlu2 %507 }
 0x283   :  { %vm527_vm0 = vcmp.ge.f32.partialorder %v1343_v2, %v508_v49 }
 0x284   :  { %v1470_v27 = vsel %vm527_vm0, %v1333_v62, 128 }
 0x285   :  { %v742_v56 = vshra.s32 %v1470_v27, 16 }
 0x286   :  { %v1473_v59 = vpop.xlane.xlu1 %549 }
 0x287   :  { %v1475_v61 = vcvt.s32.f32 %v742_v56  ;;  %vm551_vm1 = vcmp.eq.f32.partialorder %v1350_v8, %v1473_v59  ;;  %v573_v8 = vand.u32 65535, %v1372_v24  ;;  %v589_v24 = vcvt.s32.f32 %v587_v51 }
 0x288   :  { %v552_v35 = vsel %vm551_vm1, %v547_v31, inf  ;;  %vm769_vm1 = vcmp.eq.s32.totalorder %v1333_v62, 127 }
 0x289   :  { %745 = vmin.xlane.f32.xlu1 %v1475_v61  ;;  %553 = vmin.xlane.f32.xlu2 %v552_v35  ;;  %v575_v33 = vcvt.s32.f32 %v573_v8  ;;  %v617_v35 = vcvt.s32.f32 %v615_v29  ;;  %v645_v8 = vcvt.s32.f32 %v643_v41 }
 0x28a   :  { %v510_v4 = vpop.xlane.xlu0 %509 }
 0x28b   :  { %vm528_vm2 = vcmp.ge.f32.partialorder %v1361_v16, %v510_v4 }
 0x28c   :  { %v1482_v2 = vsel %vm528_vm2, %v1333_v62, 128 }
 0x28d   :  { %v756_v5 = vshra.s32 %v1482_v2, 16 }
 0x28f   :  { %v1486_v7 = vcvt.s32.f32 %v756_v5 }
 0x291   :  { %759 = vmin.xlane.f32.xlu2 %v1486_v7 }
 0x292   :  { %v1490_v43 = vpop.xlane.xlu0 %563 }
 0x293   :  { %vm565_vm3 = vcmp.eq.f32.partialorder %v1369_v3, %v1490_v43  ;;  %v601_v3 = vand.u32 65535, %v1389_v36  ;;  %v629_v36 = vand.u32 65535, %v1405_v48  ;;  %v657_v48 = vand.u32 65535, %v1421_v60 }
 0x294   :  { %v566_v16 = vsel %vm565_vm3, %v561_v11, inf  ;;  %v685_v60 = vand.u32 65535, %v1437_v12  ;;  %v713_v12 = vand.u32 65535, %v1453_v15  ;;  %v741_v15 = vand.u32 65535, %v1470_v27 }
 0x295   :  { %567 = vmin.xlane.f32.xlu0 %v566_v16  ;;  %v603_v56 = vcvt.s32.f32 %v601_v3  ;;  %v631_v5 = vcvt.s32.f32 %v629_v36  ;;  %v659_v16 = vcvt.s32.f32 %v657_v48  ;;  %v701_v3 = vcvt.s32.f32 %v699_v1 }
 0x296   :  { %v1494_v47 = vpop.xlane.xlu1 %577 }
 0x297   :  { %vm579_vm4 = vcmp.eq.f32.partialorder %v1376_v25, %v1494_v47 }
 0x298   :  { %v580_v17 = vsel %vm579_vm4, %v575_v33, inf }
 0x299   :  { %581 = vmin.xlane.f32.xlu1 %v580_v17  ;;  %v673_v17 = vcvt.s32.f32 %v671_v53  ;;  %v584_v53 = vcvt.f32.s32 %v1494_v47 }
 0x29e   :  { %v1499_v44 = vpop.xlane.xlu2 %591 }
 0x29f   :  { %vm593_vm5 = vcmp.eq.f32.partialorder %v1384_v32, %v1499_v44 }
 0x2a0   :  { %v594_v55 = vsel %vm593_vm5, %v589_v24, inf  ;;  %v687_v24 = vcvt.s32.f32 %v685_v60  ;;  %v585_v60 = vshll.u32 %v584_v53, 16 }
 0x2a1   :  { %595 = vmin.xlane.f32.xlu2 %v594_v55 }
 0x2a6   :  { %v1504_v49 = vpop.xlane.xlu0 %605 }
 0x2a7   :  { %vm607_vm6 = vcmp.eq.f32.partialorder %v1392_v40, %v1504_v49 }
 0x2a8   :  { %v608_v25 = vsel %vm607_vm6, %v603_v56, inf }
 0x2a9   :  { %609 = vmin.xlane.f32.xlu0 %v608_v25  ;;  %v715_v25 = vcvt.s32.f32 %v713_v12 }
 0x2ae   :  { %v1509_v31 = vpop.xlane.xlu1 %619 }
 0x2af   :  { %vm621_vm7 = vcmp.eq.f32.partialorder %v1400_v45, %v1509_v31 }
 0x2b0   :  { %v622_v32 = vsel %vm621_vm7, %v617_v35, inf  ;;  %v729_v35 = vcvt.s32.f32 %v727_v21 }
 0x2b1   :  { %623 = vmin.xlane.f32.xlu1 %v622_v32  ;;  %v556_v32 = vcvt.f32.s32 %v1473_v59 }
 0x2b6   :  { %v1514_v4 = vpop.xlane.xlu2 %633 }
 0x2b7   :  { %vm635_vm8 = vcmp.eq.f32.partialorder %v1408_v52, %v1514_v4 }
 0x2b8   :  { %v636_v40 = vsel %vm635_vm8, %v631_v5, inf }
 0x2b9   :  { %637 = vmin.xlane.f32.xlu2 %v636_v40  ;;  %v557_v40 = vshll.u32 %v556_v32, 16  ;;  %v626_v32 = vcvt.f32.s32 %v1509_v31 }
 0x2be   :  { %v1519_v39 = vpop.xlane.xlu0 %647 }
 0x2bf   :  { %vm649_vm9 = vcmp.eq.f32.partialorder %v1416_v57, %v1519_v39 }
 0x2c0   :  { %v650_v45 = vsel %vm649_vm9, %v645_v8, inf }
 0x2c1   :  { %651 = vmin.xlane.f32.xlu0 %v650_v45 }
 0x2c6   :  { %v1524_v11 = vpop.xlane.xlu1 %661 }
 0x2c7   :  { %vm663_vm10 = vcmp.eq.f32.partialorder %v1424_v63, %v1524_v11  ;;  %v668_v53 = vcvt.f32.s32 %v1524_v11 }
 0x2c8   :  { %v664_v52 = vsel %vm663_vm10, %v659_v16, inf }
 0x2c9   :  { %665 = vmin.xlane.f32.xlu1 %v664_v52 }
 0x2ce   :  { %v1529_v33 = vpop.xlane.xlu2 %675 }
 0x2cf   :  { %vm677_vm11 = vcmp.eq.f32.partialorder %v1432_v9, %v1529_v33 }
 0x2d0   :  { %v678_v57 = vsel %vm677_vm11, %v673_v17, inf }
 0x2d1   :  { %679 = vmin.xlane.f32.xlu2 %v678_v57 }
 0x2d6   :  { %v1534_v51 = vpop.xlane.xlu0 %689 }
 0x2d7   :  { %vm691_vm12 = vcmp.eq.f32.partialorder %v1440_v20, %v1534_v51 }
 0x2d8   :  { %v692_v63 = vsel %vm691_vm12, %v687_v24, inf }
 0x2d9   :  { %693 = vmin.xlane.f32.xlu0 %v692_v63 }
 0x2de   :  { %v1539_v55 = vpop.xlane.xlu1 %703 }
 0x2df   :  { %vm705_vm13 = vcmp.eq.f32.partialorder %v1448_v28, %v1539_v55 }
 0x2e0   :  { %v706_v9 = vsel %vm705_vm13, %v701_v3, inf }
 0x2e1   :  { %707 = vmin.xlane.f32.xlu1 %v706_v9 }
 0x2ec   :  { %v1544_v56 = vpop.xlane.xlu2 %717 }
 0x2ed   :  { %vm719_vm14 = vcmp.eq.f32.partialorder %v1456_v37, %v1544_v56  ;;  %v743_v37 = vcvt.s32.f32 %v741_v15 }
 0x2ee   :  { %v720_v20 = vsel %vm719_vm14, %v715_v25, inf }
 0x2ef   :  { %721 = vmin.xlane.f32.xlu2 %v720_v20  ;;  %v612_v20 = vcvt.f32.s32 %v1504_v49 }
 0x2f4   :  { %v1549_v29 = vpop.xlane.xlu0 %731 }
 0x2f5   :  { %vm733_vm15 = vcmp.eq.f32.partialorder %v1464_v23, %v1549_v29  ;;  %v755_v23 = vand.u32 65535, %v1482_v2 }
 0x2f6   :  { %v734_v28 = vsel %vm733_vm15, %v729_v35, inf  ;;  %v613_v35 = vshll.u32 %v612_v20, 16 }
 0x2f7   :  { %735 = vmin.xlane.f32.xlu0 %v734_v28  ;;  %v757_v48 = vcvt.s32.f32 %v755_v23 }
 0x2fc   :  { %v1555_v36 = vpop.xlane.xlu1 %745  ;;  %v554_v5 = vpop.xlane.xlu2 %553 }
 0x2fd   :  { %v555_v41 = vcvt.f32.s32 %v554_v5  ;;  %vm747_vm0 = vcmp.eq.f32.partialorder %v1475_v61, %v1555_v36  ;;  %v570_v61 = vcvt.f32.s32 %v1490_v43 }
 0x2fe   :  { %v748_v19 = vsel %vm747_vm0, %v743_v37, inf  ;;  %v627_v37 = vshll.u32 %v626_v32, 16 }
 0x2ff   :  { %v558_v8 = vadd.s32 %v557_v40, %v555_v41  ;;  %749 = vmin.xlane.f32.xlu1 %v748_v19  ;;  %v571_v52 = vshll.u32 %v570_v61, 16  ;;  %v640_v19 = vcvt.f32.s32 %v1514_v4 }
 0x301   :  { %v770_v45 = vcvt.s32.f32 %v558_v8  ;;  %v641_v23 = vshll.u32 %v640_v19, 16 }
 0x303   :  { %v786_v27 = vsel %vm769_vm1, %v770_v45, %v1197_v6 }
 0x304   :  { %802 = vst [vmem:[%s1684_s8] sm:$0xff] %v786_v27  ;;  %v1567_v59 = vpop.xlane.xlu2 %759 }
 0x305   :  { %vm761_vm2 = vcmp.eq.f32.partialorder %v1486_v7, %v1567_v59  ;;  %v598_v7 = vcvt.f32.s32 %v1499_v44 }
 0x306   :  { %v762_v2 = vsel %vm761_vm2, %v757_v48, inf  ;;  %v654_v48 = vcvt.f32.s32 %v1519_v39 }
 0x307   :  { %763 = vmin.xlane.f32.xlu2 %v762_v2  ;;  %v599_v12 = vshll.u32 %v598_v7, 16 }
 0x308   :  { %v568_v16 = vpop.xlane.xlu0 %567  ;;  %v655_v2 = vshll.u32 %v654_v48, 16 }
 0x309   :  { %v569_v17 = vcvt.f32.s32 %v568_v16 }
 0x30b   :  { %v572_v6 = vadd.s32 %v571_v52, %v569_v17 }
 0x30c   :  { %v582_v57 = vpop.xlane.xlu1 %581 }
 0x30d   :  { %v771_v24 = vcvt.s32.f32 %v572_v6  ;;  %v583_v63 = vcvt.f32.s32 %v582_v57  ;;  %v669_v6 = vshll.u32 %v668_v53, 16 }
 0x30f   :  { %v787_v1 = vsel %vm769_vm1, %v771_v24, %v1207_v10  ;;  %v586_v43 = vadd.s32 %v585_v60, %v583_v63  ;;  %v682_v24 = vcvt.f32.s32 %v1529_v33 }
 0x310   :  { %803 = vst [vmem:[%s1684_s8 + $0x8] sm:$0xff] %v787_v1 }
 0x311   :  { %v772_v3 = vcvt.s32.f32 %v586_v43  ;;  %v683_v1 = vshll.u32 %v682_v24, 16 }
 0x313   :  { %v788_v47 = vsel %vm769_vm1, %v772_v3, %v1217_v14  ;;  %v696_v3 = vcvt.f32.s32 %v1534_v51 }
 0x314   :  { %804 = vst [vmem:[%s1684_s8 + $0x10] sm:$0xff] %v788_v47  ;;  %v596_v9 = vpop.xlane.xlu2 %595 }
 0x315   :  { %v597_v25 = vcvt.f32.s32 %v596_v9  ;;  %v697_v9 = vshll.u32 %v696_v3, 16 }
 0x317   :  { %v600_v10 = vadd.s32 %v599_v12, %v597_v25 }
 0x319   :  { %v773_v21 = vcvt.s32.f32 %v600_v10  ;;  %v710_v10 = vcvt.f32.s32 %v1539_v55  ;;  %v724_v55 = vcvt.f32.s32 %v1544_v56  ;;  %v752_v56 = vcvt.f32.s32 %v1555_v36 }
 0x31b   :  { %v789_v44 = vsel %vm769_vm1, %v773_v21, %v1227_v18  ;;  %v711_v21 = vshll.u32 %v710_v10, 16 }
 0x31c   :  { %805 = vst [vmem:[%s1684_s8 + $0x18] sm:$0xff] %v789_v44  ;;  %v610_v14 = vpop.xlane.xlu0 %609 }
 0x31d   :  { %v611_v28 = vcvt.f32.s32 %v610_v14 }
 0x31f   :  { %v614_v15 = vadd.s32 %v613_v35, %v611_v28 }
 0x321   :  { %v774_v5 = vcvt.s32.f32 %v614_v15  ;;  %v725_v15 = vshll.u32 %v724_v55, 16 }
 0x323   :  { %v790_v49 = vsel %vm769_vm1, %v774_v5, %v1237_v22 }
 0x324   :  { %806 = vst [vmem:[%s1684_s8 + $0x20] sm:$0xff] %v790_v49  ;;  %v624_v18 = vpop.xlane.xlu1 %623  ;;  %v738_v49 = vcvt.f32.s32 %v1549_v29 }
 0x325   :  { %v625_v40 = vcvt.f32.s32 %v624_v18 }
 0x327   :  { %v628_v41 = vadd.s32 %v627_v37, %v625_v40  ;;  %v739_v40 = vshll.u32 %v738_v49, 16 }
 0x329   :  { %v775_v8 = vcvt.s32.f32 %v628_v41 }
 0x32b   :  { %v791_v31 = vsel %vm769_vm1, %v775_v8, %v1247_v26 }
 0x32c   :  { %807 = vst [vmem:[%s1684_s8 + $0x28] sm:$0xff] %v791_v31  ;;  %v638_v22 = vpop.xlane.xlu2 %637  ;;  %v753_v31 = vshll.u32 %v752_v56, 16 }
 0x32d   :  { %v639_v45 = vcvt.f32.s32 %v638_v22 }
 0x32f   :  { %v642_v27 = vadd.s32 %v641_v23, %v639_v45  ;;  %v766_v45 = vcvt.f32.s32 %v1567_v59 }
 0x331   :  { %v776_v61 = vcvt.s32.f32 %v642_v27  ;;  %v767_v48 = vshll.u32 %v766_v45, 16 }
 0x333   :  { %v792_v4 = vsel %vm769_vm1, %v776_v61, %v1257_v30 }
 0x334   :  { %808 = vst [vmem:[%s1684_s8 + $0x30] sm:$0xff] %v792_v4  ;;  %v652_v26 = vpop.xlane.xlu0 %651 }
 0x335   :  { %v653_v16 = vcvt.f32.s32 %v652_v26 }
 0x337   :  { %v656_v52 = vadd.s32 %v655_v2, %v653_v16 }
 0x339   :  { %v777_v17 = vcvt.s32.f32 %v656_v52 }
 0x33b   :  { %v793_v39 = vsel %vm769_vm1, %v777_v17, %v1267_v34 }
 0x33c   :  { %809 = vst [vmem:[%s1684_s8 + $0x38] sm:$0xff] %v793_v39  ;;  %v666_v30 = vpop.xlane.xlu1 %665 }
 0x33d   :  { %v667_v57 = vcvt.f32.s32 %v666_v30 }
 0x33f   :  { %v670_v60 = vadd.s32 %v669_v6, %v667_v57 }
 0x341   :  { %v778_v63 = vcvt.s32.f32 %v670_v60 }
 0x343   :  { %v794_v11 = vsel %vm769_vm1, %v778_v63, %v1277_v38 }
 0x344   :  { %810 = vst [vmem:[%s1684_s8 + $0x40] sm:$0xff] %v794_v11  ;;  %v680_v34 = vpop.xlane.xlu2 %679 }
 0x345   :  { %v681_v43 = vcvt.f32.s32 %v680_v34 }
 0x347   :  { %v684_v7 = vadd.s32 %v683_v1, %v681_v43 }
 0x349   :  { %v779_v47 = vcvt.s32.f32 %v684_v7 }
 0x34b   :  { %v795_v33 = vsel %vm769_vm1, %v779_v47, %v1287_v42 }
 0x34c   :  { %811 = vst [vmem:[%s1684_s8 + $0x48] sm:$0xff] %v795_v33  ;;  %v694_v38 = vpop.xlane.xlu0 %693 }
 0x34d   :  { %v695_v12 = vcvt.f32.s32 %v694_v38 }
 0x34f   :  { %v698_v25 = vadd.s32 %v697_v9, %v695_v12 }
 0x351   :  { %v780_v20 = vcvt.s32.f32 %v698_v25 }
 0x353   :  { %v796_v51 = vsel %vm769_vm1, %v780_v20, %v1297_v46 }
 0x354   :  { %812 = vst [vmem:[%s1684_s8 + $0x50] sm:$0xff] %v796_v51  ;;  %v708_v42 = vpop.xlane.xlu1 %707 }
 0x355   :  { %v709_v44 = vcvt.f32.s32 %v708_v42 }
 0x357   :  { %v712_v14 = vadd.s32 %v711_v21, %v709_v44 }
 0x359   :  { %v781_v35 = vcvt.s32.f32 %v712_v14 }
 0x35b   :  { %v797_v28 = vsel %vm769_vm1, %v781_v35, %v1307_v50 }
 0x35c   :  { %813 = vst [vmem:[%s1684_s8 + $0x58] sm:$0xff] %v797_v28 }
 0x362   :  { %v722_v46 = vpop.xlane.xlu2 %721 }
 0x363   :  { %v723_v32 = vcvt.f32.s32 %v722_v46 }
 0x365   :  { %v726_v5 = vadd.s32 %v725_v15, %v723_v32 }
 0x367   :  { %v782_v18 = vcvt.s32.f32 %v726_v5 }
 0x369   :  { %v798_v37 = vsel %vm769_vm1, %v782_v18, %v1317_v54 }
 0x36a   :  { %814 = vst [vmem:[%s1684_s8 + $0x60] sm:$0xff] %v798_v37  ;;  %v736_v50 = vpop.xlane.xlu0 %735 }
 0x36b   :  { %v737_v41 = vcvt.f32.s32 %v736_v50 }
 0x36d   :  { %v740_v19 = vadd.s32 %v739_v40, %v737_v41 }
 0x36f   :  { %v783_v8 = vcvt.s32.f32 %v740_v19 }
 0x371   :  { %v799_v29 = vsel %vm769_vm1, %v783_v8, %v1327_v58 }
 0x372   :  { %815 = vst [vmem:[%s1684_s8 + $0x68] sm:$0xff] %v799_v29  ;;  %v750_v54 = vpop.xlane.xlu1 %749 }
 0x373   :  { %v751_v22 = vcvt.f32.s32 %v750_v54 }
 0x375   :  { %v754_v23 = vadd.s32 %v753_v31, %v751_v22 }
 0x377   :  { %v784_v27 = vcvt.s32.f32 %v754_v23 }
 0x379   :  { %v800_v36 = vsel %vm769_vm1, %v784_v27, %v1339_v0 }
 0x37a   :  { %816 = vst [vmem:[%s1684_s8 + $0x70] sm:$0xff] %v800_v36  ;;  %v764_v58 = vpop.xlane.xlu2 %763 }
 0x37b   :  { %v765_v61 = vcvt.f32.s32 %v764_v58 }
 0x37d   :  { %v768_v4 = vadd.s32 %v767_v48, %v765_v61 }
 0x37f   :  { %v785_v26 = vcvt.s32.f32 %v768_v4 }
 0x381   :  { %v801_v2 = vsel %vm769_vm1, %v785_v26, %v1356_v13 }
 0x382   :  { %817 = vst [vmem:[%s1684_s8 + $0x78] sm:$0xff] %v801_v2 }

</bundles_post_ra>
